<compile_context>
chip_gen: v5e
topology: v5e:2x2
jax: 0.10.0
libtpu: 0.0.40
codegen_flags: <defaults>
</compile_context>

<pallas_src>
import numpy as np
import jax
import jax.numpy as jnp
from jax.experimental import pallas as pl
from jax.experimental.pallas import tpu as pltpu

# ----------------------------------------------------------------------------
# Host-side construction of the 1-D bicubic interpolation matrices.
# Matches torch.nn.functional.interpolate(mode='bicubic', align_corners=False):
# A = -0.75, src = (dst + 0.5) * scale - 0.5, 4 taps at floor(src)-1..+2 with
# index clamping (accumulated weights at clamped indices == border replicate).
# ----------------------------------------------------------------------------
_A = -0.75


def _cubic1(x):
    return ((_A + 2.0) * x - (_A + 3.0)) * x * x + 1.0


def _cubic2(x):
    return ((_A * x - 5.0 * _A) * x + 8.0 * _A) * x - 4.0 * _A


def _bicubic_matrix(in_size: int, out_size: int) -> np.ndarray:
    """(out_size, in_size) matrix M so that (M @ v) equals PyTorch's 1-D
    bicubic resampling of v (align_corners=False, clamped taps)."""
    m = np.zeros((out_size, in_size), np.float64)
    scale = in_size / out_size
    for i in range(out_size):
        src = (i + 0.5) * scale - 0.5
        base = int(np.floor(src))
        t = src - base
        coeffs = (_cubic2(t + 1.0), _cubic1(t), _cubic1(1.0 - t), _cubic2(2.0 - t))
        for k, c in enumerate(coeffs):
            idx = min(max(base - 1 + k, 0), in_size - 1)
            m[i, idx] += c
    return m.astype(np.float32)


def _pick_row_tile(h: int) -> int:
    """Largest output-row tile (multiple of 16, <=512) that divides H; falls
    back to the full extent (exempt from the divisibility rule)."""
    for th in (512, 256, 128, 64, 32, 16):
        if h % th == 0:
            return th
    return h


def _round_up(x: int, m: int) -> int:
    return -(-x // m) * m


# ----------------------------------------------------------------------------
# Pallas kernel: one (batch, H-tile) grid step = two bf16 MXU matmuls with f32
# accumulation.  Batch dim is squeezed out of pred/out, so all refs are 2-D.
# ----------------------------------------------------------------------------
def _bicubic_kernel(wy_ref, wxt_ref, pred_ref, out_ref):
    # wy_ref  : (TH, Hp_pad)      bf16  rows of the row-interp matrix
    # wxt_ref : (Wp_pad, W)       bf16  transposed column-interp matrix
    # pred_ref: (Hp_pad, Wp_pad)  bf16  raw depth prediction (zero-padded)
    # out_ref : (TH, W)           f32
    tmp = jnp.dot(wy_ref[...], pred_ref[...],
                  preferred_element_type=jnp.float32)          # (TH, Wp_pad)
    out_ref[...] = jnp.dot(tmp.astype(jnp.bfloat16), wxt_ref[...],
                           preferred_element_type=jnp.float32)  # (TH, W)


def bicubic_resize(pred, size):
    """pred: (B, Hp, Wp) float -> (B, H, W) float32, PyTorch-style bicubic."""
    B, Hp, Wp = pred.shape
    H, W = size

    # Zero-pad contraction dims to multiples of 128 (exact: padded taps are 0).
    Hp_pad = _round_up(Hp, 128)
    Wp_pad = _round_up(Wp, 128)

    wy = _bicubic_matrix(Hp, H)          # (H, Hp)
    wxt = _bicubic_matrix(Wp, W).T       # (Wp, W)
    if Hp_pad != Hp:
        wy = np.pad(wy, ((0, 0), (0, Hp_pad - Hp)))
    if Wp_pad != Wp:
        wxt = np.pad(wxt, ((0, Wp_pad - Wp), (0, 0)))
    wy = jnp.asarray(wy, dtype=jnp.bfloat16)       # (H, Hp_pad)
    wxt = jnp.asarray(wxt, dtype=jnp.bfloat16)     # (Wp_pad, W)

    pred_b = pred.astype(jnp.bfloat16)
    if (Hp_pad != Hp) or (Wp_pad != Wp):
        pred_b = jnp.pad(pred_b, ((0, 0), (0, Hp_pad - Hp), (0, Wp_pad - Wp)))

    TH = _pick_row_tile(H)
    grid = (B, H // TH)

    # VMEM budget for the chosen tiles (drives vmem_limit_bytes explicitly;
    # v5e scoped default is 16 MiB, v7x physical VMEM is 64 MiB).
    vmem_bytes = (2 * TH * W * 4            # double-buffered f32 output tile
                  + 2 * TH * Hp_pad * 2     # double-buffered bf16 wy tile
                  + 1 * Wp_pad * W * 2      # single-buffered bf16 wxt
                  + 2 * Hp_pad * Wp_pad * 2  # double-buffered bf16 pred
                  + TH * Wp_pad * 4)        # f32 intermediate
    vmem_limit = int(min(max(2 * vmem_bytes, 32 << 20), 64 << 20))

    return pl.pallas_call(
        _bicubic_kernel,
        out_shape=jax.ShapeDtypeStruct((B, H, W), jnp.float32),
        grid=grid,
        in_specs=[
            # wy: one row-tile per H-tile grid step.
            pl.BlockSpec((TH, Hp_pad), lambda b, i: (i, 0)),
            # wxt: constant index -> stays VMEM-resident; single-buffered.
            pl.BlockSpec((Wp_pad, W), lambda b, i: (0, 0),
                         pipeline_mode=pl.Buffered(1)),
            # pred: batch dim squeezed, constant across H tiles of a batch.
            pl.BlockSpec((None, Hp_pad, Wp_pad), lambda b, i: (b, 0, 0)),
        ],
        out_specs=pl.BlockSpec((None, TH, W), lambda b, i: (b, i, 0)),
        compiler_params=pltpu.CompilerParams(
            dimension_semantics=("parallel", "parallel"),
            vmem_limit_bytes=vmem_limit),
    )(wy, wxt, pred_b)


# ----------------------------------------------------------------------------
# Module-level forward (minus the untranslatable MiDaS backbone).
# ----------------------------------------------------------------------------
def depth_map_forward(img, predict):
    """DepthMap.forward: given the raw MiDaS prediction `predict` (B, Hp, Wp),
    return F.interpolate(predict.unsqueeze(1), size=img.shape[-2:],
    mode='bicubic', align_corners=False) as (B, 1, H, W)."""
    H, W = img.shape[-2], img.shape[-1]
    out = bicubic_resize(predict, (H, W))   # (B, H, W)
    return out[:, None, :, :]               # unsqueeze(1)


if __name__ == "__main__":
    key = jax.random.PRNGKey(0)
    k_img, k_pred = jax.random.split(key)

    B, C, H, W = 2, 3, 16, 16       # NCHW input image, as the module expects
    Hp, Wp = 8, 8                   # stand-in spatial size of the raw depth map

    img = jax.random.uniform(k_img, (B, C, H, W), dtype=jnp.float32)
    # Deterministic stand-in for self.model(img) (MiDaS DPT_Large output).
    predict = jax.random.uniform(k_pred, (B, Hp, Wp), dtype=jnp.float32)

    out = jax.jit(depth_map_forward)(img, predict)
    jax.block_until_ready(out)

    assert out.shape == (B, 1, H, W)
    assert out.dtype == jnp.float32
    assert bool(jnp.all(jnp.isfinite(out)))
    print("KERNEL_OK")
</pallas_src>

<mosaic_0001>
module attributes {stable_mosaic.version = 11 : i64} {
  func.func @_bicubic_kernel(%arg0: i32, %arg1: i32, %arg2: memref<16x128xbf16, #tpu.memory_space<vmem>>, %arg3: memref<128x16xbf16, #tpu.memory_space<vmem>>, %arg4: memref<1x128x128xbf16, #tpu.memory_space<vmem>>, %arg5: memref<1x16x16xf32, #tpu.memory_space<vmem>>) attributes {dimension_semantics = [#tpu.dimension_semantics<parallel>, #tpu.dimension_semantics<parallel>], iteration_bounds = array<i64: 2, 1>, scalar_prefetch = 0 : i64, scratch_operands = 0 : i64, tpu.core_type = #tpu.core_type<tc>, window_params = [{transform_indices = @transform_0, window_bounds = array<i64: 16, 128>}, {pipeline_mode = #tpu.pipeline_mode<synchronous>, transform_indices = @transform_1, window_bounds = array<i64: 128, 16>}, {transform_indices = @transform_2, window_bounds = array<i64: 1, 128, 128>}, {transform_indices = @transform_3, window_bounds = array<i64: 1, 16, 16>}]} {
    %c0 = arith.constant 0 : index
    %c0_0 = arith.constant 0 : index
    %0 = vector.load %arg2[%c0, %c0_0] : memref<16x128xbf16, #tpu.memory_space<vmem>>, vector<16x128xbf16>
    %c0_1 = arith.constant 0 : index
    %c0_2 = arith.constant 0 : index
    %c0_3 = arith.constant 0 : index
    %1 = vector.load %arg4[%c0_1, %c0_2, %c0_3] : memref<1x128x128xbf16, #tpu.memory_space<vmem>>, vector<1x128x128xbf16>
    %2 = vector.shape_cast %1 : vector<1x128x128xbf16> to vector<128x128xbf16>
    %cst = arith.constant dense<0.000000e+00> : vector<16x128xf32>
    %3 = tpu.matmul %0, %2, %cst {dimension_numbers = #tpu.dot_dimension_numbers<[1], [0], [0], [1], [0, 0, 1, 1], [], []>} : vector<16x128xbf16>, vector<128x128xbf16>, vector<16x128xf32> -> vector<16x128xf32>
    %4 = arith.truncf %3 : vector<16x128xf32> to vector<16x128xbf16>
    %c0_4 = arith.constant 0 : index
    %c0_5 = arith.constant 0 : index
    %5 = vector.load %arg3[%c0_4, %c0_5] : memref<128x16xbf16, #tpu.memory_space<vmem>>, vector<128x16xbf16>
    %cst_6 = arith.constant dense<0.000000e+00> : vector<16x16xf32>
    %6 = tpu.matmul %4, %5, %cst_6 {dimension_numbers = #tpu.dot_dimension_numbers<[1], [0], [0], [1], [0, 0, 1, 1], [], []>} : vector<16x128xbf16>, vector<128x16xbf16>, vector<16x16xf32> -> vector<16x16xf32>
    %c0_7 = arith.constant 0 : index
    %c0_8 = arith.constant 0 : index
    %c0_9 = arith.constant 0 : index
    %7 = vector.load %arg5[%c0_7, %c0_8, %c0_9] : memref<1x16x16xf32, #tpu.memory_space<vmem>>, vector<1x16x16xf32>
    %8 = vector.shape_cast %7 : vector<1x16x16xf32> to vector<16x16xf32>
    %9 = vector.shape_cast %6 : vector<16x16xf32> to vector<1x16x16xf32>
    tpu.vector_store %arg5[%c0_7, %c0_8, %c0_9], %9 {strides = array<i32>} : memref<1x16x16xf32, #tpu.memory_space<vmem>>, vector<1x16x16xf32>,
    return
  }
  func.func @transform_0(%arg0: i32, %arg1: i32) -> (i32, i32) {
    %c0_i32 = arith.constant 0 : i32
    %c0_i32_0 = arith.constant 0 : i32
    return %arg1, %c0_i32 : i32, i32
  }
  func.func @transform_1(%arg0: i32, %arg1: i32) -> (i32, i32) {
    %c0_i32 = arith.constant 0 : i32
    %c0_i32_0 = arith.constant 0 : i32
    %c0_i32_1 = arith.constant 0 : i32
    return %c0_i32, %c0_i32_0 : i32, i32
  }
  func.func @transform_2(%arg0: i32, %arg1: i32) -> (i32, i32, i32) {
    %c0_i32 = arith.constant 0 : i32
    %c0_i32_0 = arith.constant 0 : i32
    %c0_i32_1 = arith.constant 0 : i32
    return %arg0, %c0_i32, %c0_i32_0 : i32, i32, i32
  }
  func.func @transform_3(%arg0: i32, %arg1: i32) -> (i32, i32, i32) {
    %c0_i32 = arith.constant 0 : i32
    %c0_i32_0 = arith.constant 0 : i32
    return %arg0, %arg1, %c0_i32 : i32, i32, i32
  }
}

</mosaic_0001>

<bundles_post_ra>
// kernel: depth_map_forward.1
= control target key start
LH: loop header
LB: loop body
LE: loop exit
PB: predicated region body
PF: predicated region fallthrough
CT: control target
= control target key end

     0   :  { %8 = vsyncpa [#allocation3], 0  ;;  %s864_s0 = inlined_call_operand.vmem [shape: bf16[16,128], index: 0, kind: input, shape index: {}]   ;;  %s865_s1 = inlined_call_operand.vmem [shape: bf16[128,16], index: 1, kind: input, shape index: {}]   ;;  %s866_s2 = inlined_call_operand.vmem [shape: bf16[2,128,128], index: 2, kind: input, shape index: {}]   ;;  %s867_s3 = inlined_call_operand.hbm [shape: f32[2,16,16], index: 3, kind: output, shape index: {}]  }
   0x1   :  { %10 = vsyncpa [#allocation3 + $0x1], 0  ;;  %s740_s12 = smov 0   ;;  %s742_s13 = smov 0  }
   0x2   :  { %s744_s14 = smov 0   ;;  %s746_s15 = smov 0  }
   0x3   :  { %s748_s16 = smov 0   ;;  %s750_s17 = smov 0  }
   0x4 LB: > { %s480_s18 = sadd.s32 4294967295, %s716_s17   ;;  %s481_s19 = sadd.s32 4294967294, %s716_s17   ;;  %s716_s17 = sphi %s750_s17, %s16_s17   ;;  %s712_s16 = sphi %s748_s16, %s874_s16   ;;  %s708_s15 = sphi %s746_s15, %s873_s15   ;;  %s704_s14 = sphi %s744_s14, %s872_s14   ;;  %s700_s13 = sphi %s742_s13, %s871_s13   ;;  %s696_s12 = sphi %s740_s12, %s870_s12  }
   0x5   : > { %s28_s20 = sadd.s32 1, %s712_s16  ;;  %s110_s21 = sadd.s32 1, %s704_s14 }
   0x6   : > { %p30_p0 = scmp.ge.s32.totalorder %s28_s20, 2  ;;  %p120_p1 = scmp.ne.s32.totalorder %s704_s14, %s700_s13 }
   0x7   : > { %p121_p2 = scmp.eq.s32.totalorder %s480_s18, 1  ;;  %p126_p3 = scmp.ne.s32.totalorder %s700_s13, %s696_s12 }
   0x8   : > { %s876_s20 = smov (%p30_p0, %s28_s20), 0  ;;  %p127_p5 = scmp.eq.s32.totalorder %s481_s19, 1 }
   0x9   : > { %p780_p4 = por %p121_p2, %p120_p1  ;;  %s105_s23 = ssub.s32 %s712_s16, %s876_s20 }
   0xa   : > { %p485_p6 = scmp.ge.s32.totalorder %s716_s17, 1  ;;  %p108_p7 = scmp.eq.s32.totalorder %s105_s23, 0 }
   0xb   : > { %p787_p8 = por %p127_p5, %p126_p3  ;;  %p165_p9 = scmp.lt.s32.totalorder %s716_s17, 3 }
   0xc   : > { %s793_s25 = scalar_select %p108_p7, %s704_s14, %s110_s21  }
   0xd   : > { %p166_p10 = pnand %p485_p6, %p165_p9 }
   0xe   : > { %p200_p11 = scmp.lt.s32.totalorder (!%p166_p10), %s708_s15, 1  ;;  %s580_s7 = sshll.u32 (!%p166_p10), %s708_s15, 4 }
   0xf   : > { %169 = sbr.rel (%p166_p10) target bundleno = 330 (0x14a), region = 32  ;;  %s388_s10 = scalar_lea.hbm (!%p166_p10), %s867_s3, %s580_s7 }
  0x10   : > { %s391_s19 = sshll.u32 (!%p166_p10), %s388_s10, 4  ;;  %s658_s28 = scalar_lea.hbm (!%p166_p10), %s867_s3, 32  ;;  %s392_s19 = int_to_ptr.hbm [resolvable:$true] %s391_s19 }
  0x11   : > { %s652_s23 = sshra.s32 (!%p166_p10), %s392_s19, 4  ;;  %s653_s23 = int_to_ptr.hbm [resolvable:$true] %s652_s23 }
  0x12   : > { %p659_p1 = scmp.lt.s32.totalorder (!%p166_p10), %s653_s23, %s867_s3 }
  0x14   : > { %s201_s26 = scalar_select %p200_p11, %s708_s15, 1  ;;  %v579_v2 = vld [vmem:[%s865_s1 + $0x38] sm:$0xff]  ;;  %v578_v3 = vld [vmem:[%s865_s1 + $0x30] sm:$0xff]  ;;  %v577_v5 = vld [vmem:[%s865_s1 + $0x28] sm:$0xff]  ;;  %vm371_vm0 = vcmask 130048  }
  0x15   : > { %357 = vmatpush.bf16.msra.mxu1 %v579_v2  ;;  %v576_v7 = vld [vmem:[%s865_s1 + $0x20] sm:$0xff]  ;;  %v575_v9 = vld [vmem:[%s865_s1 + $0x18] sm:$0xff]  ;;  %v574_v14 = vld [vmem:[%s865_s1 + $0x10] sm:$0xff] }
  0x16   : > { %s562_s27 = sshll.u32 %s201_s26, 6  ;;  %v563_v13 = vld [vmem:[%s864_s0] sm:$0xff]  ;;  %v573_v15 = vld [vmem:[%s865_s1 + $0x8] sm:$0xff]  ;;  %s654_s26 = scalar_lea.hbm %s653_s23, 16 }
  0x17   : > { %s204_s30 = scalar_lea.vmem %s866_s2, %s562_s27  ;;  %v572_v16 = vld [vmem:[%s865_s1] sm:$0xff]  ;;  %p655_p12 = scmp.ne.s32.totalorder %s653_s23, %s654_s26 }
  0x18   : > { %v571_v0 = vld [vmem:[%s204_s30 + $0x38] sm:$0xff]  ;;  %v570_v1 = vld [vmem:[%s204_s30 + $0x30] sm:$0xff]  ;;  %v569_v4 = vld [vmem:[%s204_s30 + $0x28] sm:$0xff]  ;;  %p660_p2 = scmp.lt.s32.totalorder %s658_s28, %s654_s26 }
  0x19   : > { %278 = vmatpush.bf16.msra.mxu0 %v571_v0  ;;  %358 = vmatpush.bf16.msra.mxu1 %v578_v3  ;;  %v568_v6 = vld [vmem:[%s204_s30 + $0x20] sm:$0xff]  ;;  %v567_v8 = vld [vmem:[%s204_s30 + $0x18] sm:$0xff]  ;;  %v566_v10 = vld [vmem:[%s204_s30 + $0x10] sm:$0xff]  ;;  %p656_p13 = pnand %p655_p12, %p780_p4 }
  0x1a   : > { %v565_v11 = vld [vmem:[%s204_s30 + $0x8] sm:$0xff]  ;;  %v564_v12 = vld [vmem:[%s204_s30] sm:$0xff]  ;;  %s191_s30 = sand.u32 1, %s700_s13   ;;  %p661_p3 = por %p660_p2, %p659_p1 }
  0x1b   : > { %s486_s6 = sshll.u32 %s191_s30, 4  ;;  %s375_s21 = scalar_lea.sflag [#allocation3], %s191_s30 }
  0x1c   : > { %s193_s11 = scalar_lea.vmem [#allocation2], %s486_s6  ;;  %p657_p0 = pneg %p656_p13 }
  0x1d   : > { %279 = vmatpush.bf16.msra.mxu0 %v570_v1  ;;  %359 = vmatpush.bf16.msra.mxu1 %v577_v5  ;;  %s389_s18 = sshll.u32 %s193_s11, 4  ;;  %s390_s18 = int_to_ptr.vmem [resolvable:$true] %s389_s18 }
  0x1e   : > { %p662_p5 = pnand %p661_p3, %p657_p0 }
  0x21   : > { %280 = vmatpush.bf16.msra.mxu0 %v569_v4  ;;  %360 = vmatpush.bf16.msra.mxu1 %v576_v7 }
  0x25   : > { %281 = vmatpush.bf16.msra.mxu0 %v568_v6  ;;  %361 = vmatpush.bf16.msra.mxu1 %v575_v9 }
  0x29   : > { %282 = vmatpush.bf16.msra.mxu0 %v567_v8  ;;  %362 = vmatpush.bf16.msra.mxu1 %v574_v14 }
  0x2d   : > { %283 = vmatpush.bf16.msra.mxu0 %v566_v10  ;;  %363 = vmatpush.bf16.msra.mxu1 %v573_v15 }
  0x31   : > { %284 = vmatpush.bf16.msra.mxu0 %v565_v11  ;;  %364 = vmatpush.bf16.msra.mxu1 %v572_v16 }
  0x35   : > { %285 = vmatpush.bf16.msra.mxu0 %v564_v12 }
  0x38   : > { %286 = vmatmul.bf16.vlgmr.msra.gmra.mxu0 %v563_v13 }
  0xb5   : > { %v287_v17 = vpop.f32.mrf.mxu0 }
  0xbd   : > { %v289_v18 = vpop.f32.mrf.mxu0 }
  0xbe   : > { %v292_v19 = vpack.c.bf16 %v289_v18, %v287_v17 }
  0xc0   : > { %365 = vmatmul.bf16.vlgmr.msra.gmra.mxu1 %v292_v19 }
 0x13d   : > { %v366_v20 = vpop.f32.mrf.mxu1 }
 0x13e   : > { %372 = vst.msk [vmem:[%s193_s11] sm:$0xff] %vm371_vm0, %v366_v20 }
 0x145   : > { %v368_v21 = vpop.f32.mrf.mxu1 }
 0x146   : > { %373 = vst.msk [vmem:[%s193_s11 + $0x8] sm:$0xff] %vm371_vm0, %v368_v21 }
 0x147   : > { %665 = shalt.err (!%p662_p5)
}
 0x148   : > { %s718_s5 = smov 128   ;;  %s719_s30 = smov 8  }
 0x149   : > { %581 = dma.vmem_to_hbm [thread:$0]  (%p780_p4), %s390_s18, 256, %s392_s19, %s375_s21, %s718_s5, %s718_s5, %s719_s30  }
 0x14a PF: > { %p587_p6 = scmp.ge.s32.totalorder %s716_s17, 2  ;;  %s406_s6 = sand.u32 1, %s696_s12  }
 0x14b   : > { %s407_s7 = scalar_lea.sflag [#allocation3], %s406_s6 }
 0x14c   : > { %p584_p7 = pnand %p587_p6, %p787_p8 }
 0x14e   : > { %p585_p9 = pneg %p584_p7 }
 0x150   : > { %691 = dma.done.wait (%p585_p9), %s407_s7, 256  }
 0x151   : > { %693 = vsyncadd (%p585_p9), %s407_s7, 4294967040  ;;  %s16_s17 = sadd.s32 1, %s716_s17   ;;  %s870_s12 = smov %s700_s13 }
 0x152   : > { %p13_p10 = scmp.ge.s32.totalorder %s16_s17, 4   ;;  %s871_s13 = smov %s704_s14 }
 0x153   : > { %s872_s14 = smov %s793_s25  ;;  %s873_s15 = smov %s712_s16 }
 0x154   : > { %s874_s16 = smov %s876_s20  ;;  %15 = sbr.rel (!%p13_p10) target bundleno = 4 (0x4), region = 70 }
 0x159   :  { %413 = vsyncpa [#allocation3], 1 }
 0x15a   :  { %415 = vsyncpa [#allocation3 + $0x1], 1 }

</bundles_post_ra>
